<compile_context>
chip_gen: v7x
topology: tpu7x:2x2x1
jax: 0.10.0
libtpu: 0.0.40
codegen_flags: <defaults>
</compile_context>

<pallas_src>
import functools

import jax
import jax.numpy as jnp
from jax.experimental import pallas as pl
from jax.experimental.pallas import tpu as pltpu

# small synthetic hyperparameters (hp.encoder_dim, hp.duration_predictor_filter_size,
# hp.duration_predictor_kernel_size)
ENCODER_DIM = 32
FILTER_SIZE = 32
KERNEL_SIZE = 3
PAD = 1
LN_EPS = 1e-5          # PyTorch nn.LayerNorm default eps
LANE = 128
TARGET_COLS = 4096     # lane columns per grid step (review suggested 2048-8192)

assert ENCODER_DIM == FILTER_SIZE  # shared boundary masks assume equal channel counts


def _conv_ln_relu(h, w_ref, b, g, be, first_mask, last_mask):
    """Conv1d(K=3, pad=1) -> LayerNorm(channel) -> ReLU in (C, N) layout.
    T is on lanes, sequences concatenated along lanes.  w_ref: (3, Cout, Cin) tap-major
    (tap 0 = t-1, 1 = t, 2 = t+1); b/g/be: (Cout, 1)."""
    n = h.shape[1]
    # Taps via XLU lane rotation; per-sequence masks emulate the Conv1d zero padding and
    # prevent adjacent sequences from leaking into each other.
    prev_t = jnp.where(first_mask, 0.0, pltpu.roll(h, shift=1, axis=1))       # h[t-1]
    next_t = jnp.where(last_mask, 0.0, pltpu.roll(h, shift=n - 1, axis=1))    # h[t+1]
    # Three accumulating MXU matmuls instead of an im2col concat (no (3C,N) VMEM temp,
    # no sublane-copy relayouts on the VPU; MXU has plenty of slack at these shapes).
    acc = jnp.dot(w_ref[1], h, preferred_element_type=jnp.float32)
    acc = acc + jnp.dot(w_ref[0], prev_t, preferred_element_type=jnp.float32)
    acc = acc + jnp.dot(w_ref[2], next_t, preferred_element_type=jnp.float32)
    acc = acc + b
    # Two-pass LayerNorm statistics over the channel (sublane) axis.
    mu = jnp.mean(acc, axis=0, keepdims=True)
    d = acc - mu
    var = jnp.mean(d * d, axis=0, keepdims=True)
    out = d * jax.lax.rsqrt(var + LN_EPS) * g + be                            # EUP rsqrt
    return jnp.maximum(out, 0.0)


def duration_predictor_kernel(x_ref, vec_ref, w1_ref, w2_ref, wl_ref, o_ref,
                              *, t_valid, tp, spc):
    x = x_ref[...].astype(jnp.float32)       # (Cin, N): bf16 in HBM -> f32 math (v5e-safe)
    n = x.shape[1]
    vec = vec_ref[...]                       # (32, 8) packed per-channel params (resident)

    # Hoisted per-sequence boundary masks, shared by both conv layers.
    col = jax.lax.broadcasted_iota(jnp.int32, (FILTER_SIZE, n), 1)
    if (tp & (tp - 1)) == 0:
        pos = col & (tp - 1)
    else:
        pos = col % tp
    first_mask = pos == 0                    # first col of each sequence: zero the prev tap
    last_mask = pos >= (t_valid - 1)         # col >= T-1: zero the next tap (and padding)

    # conv1d_1 -> layer_norm_1 -> relu_1   (dropout_1 = identity at inference)
    h = _conv_ln_relu(x, w1_ref, vec[:, 0:1], vec[:, 1:2], vec[:, 2:3],
                      first_mask, last_mask)
    # conv1d_2 -> layer_norm_2 -> relu_2   (dropout_2 = identity at inference)
    h = _conv_ln_relu(h, w2_ref, vec[:, 3:4], vec[:, 4:5], vec[:, 5:6],
                      first_mask, last_mask)

    # linear_layer (filter_size -> 1) on the MXU, + scalar bias, ReLU
    y = jnp.dot(wl_ref[...], h, preferred_element_type=jnp.float32)           # (1, N)
    y = jnp.maximum(y + vec[0:1, 6:7], 0.0)

    # Store a sublane/lane-dense (spc, tp) block; spc is small & static -> unrolled rows.
    for s in range(spc):
        o_ref[pl.ds(s, 1), :] = y[:, s * tp:(s + 1) * tp]


def duration_predictor(x, params):
    """x: (B, T, ENCODER_DIM) f32 -> (1, B, T) f32 (eval-mode output of the module)."""
    B, T, _ = x.shape
    w1, w2, vec, wl = params

    tp = pl.cdiv(T, LANE) * LANE                      # T padded to a lane multiple
    # Sequences per grid step: large enough to amortize per-step overhead / produce big
    # DMAs, small enough to keep >= 2 grid steps (v7x: shard across both TensorCores)
    # and a small VMEM footprint (v7x: 64 MiB physical).
    spc = max(1, min(B, TARGET_COLS // tp))
    if B >= 2:
        spc = min(spc, (B + 1) // 2)
    n_chunks = pl.cdiv(B, spc)
    b_pad = n_chunks * spc
    chunk = spc * tp

    # Channel-last -> (C, B_pad * Tp): batch flattened onto lanes; bf16 storage in HBM.
    xt = jnp.transpose(x, (0, 2, 1))                               # (B, C, T)
    xt = jnp.pad(xt, ((0, b_pad - B), (0, 0), (0, tp - T)))        # (B_pad, C, Tp)
    xt = jnp.transpose(xt, (1, 0, 2)).reshape(ENCODER_DIM, b_pad * tp)
    xt = xt.astype(jnp.bfloat16)

    kernel = functools.partial(duration_predictor_kernel, t_valid=T, tp=tp, spc=spc)
    const2 = lambda i: (0, 0)        # resident weights: invariant block -> loaded once
    const3 = lambda i: (0, 0, 0)

    out = pl.pallas_call(
        kernel,
        grid=(n_chunks,),
        in_specs=[
            pl.BlockSpec((ENCODER_DIM, chunk), lambda i: (0, i)),  # activation chunk
            pl.BlockSpec(vec.shape, const2),                       # packed vectors (32, 8)
            pl.BlockSpec(w1.shape, const3),                        # conv1 taps (3, 32, 32)
            pl.BlockSpec(w2.shape, const3),                        # conv2 taps (3, 32, 32)
            pl.BlockSpec(wl.shape, const2),                        # final linear (1, 32)
        ],
        out_specs=pl.BlockSpec((None, spc, tp), lambda i: (i, 0, 0)),
        out_shape=jax.ShapeDtypeStruct((n_chunks, spc, tp), jnp.float32),
        compiler_params=pltpu.CompilerParams(
            dimension_semantics=("parallel",),   # chunks are independent
        ),
    )(xt, vec, w1, w2, wl)

    out = out.reshape(b_pad, tp)[:B, :T]         # drop batch/lane padding -> (B, T)
    # PyTorch eval path: out.squeeze() -> (B, T) for B > 1; then unsqueeze(0) -> (1, B, T).
    # TODO(synk): for B == 1 PyTorch's squeeze() would yield (1, T); we keep (1, 1, T).
    return out[None]


def init_params(key):
    """Deterministic synthetic init mirroring the module's __init__ shapes, stored in
    the kernel-friendly layouts (tap-major conv weights, packed per-channel vectors)."""
    k1, k2, k3, kb1, kb2, kbl = jax.random.split(key, 6)

    def xavier(k, shape, fan_in, fan_out):
        bound = (6.0 / (fan_in + fan_out)) ** 0.5
        return jax.random.uniform(k, shape, jnp.float32, -bound, bound)

    # PyTorch Conv1d weight layout (Cout, Cin, K); fan_in = Cin*K, fan_out = Cout*K.
    w1_pt = xavier(k1, (FILTER_SIZE, ENCODER_DIM, KERNEL_SIZE),
                   ENCODER_DIM * KERNEL_SIZE, FILTER_SIZE * KERNEL_SIZE)
    w2_pt = xavier(k2, (FILTER_SIZE, FILTER_SIZE, KERNEL_SIZE),
                   FILTER_SIZE * KERNEL_SIZE, FILTER_SIZE * KERNEL_SIZE)
    # Kernel layout: (K, Cout, Cin) tap-major; tap 0 = t-1, 1 = t, 2 = t+1.
    w1 = jnp.transpose(w1_pt, (2, 0, 1))
    w2 = jnp.transpose(w2_pt, (2, 0, 1))

    b1 = jax.random.uniform(kb1, (FILTER_SIZE,), jnp.float32, -0.1, 0.1)
    b2 = jax.random.uniform(kb2, (FILTER_SIZE,), jnp.float32, -0.1, 0.1)
    g1 = jnp.ones((FILTER_SIZE,), jnp.float32)      # LayerNorm gamma=1, beta=0 (default)
    be1 = jnp.zeros((FILTER_SIZE,), jnp.float32)
    g2 = jnp.ones((FILTER_SIZE,), jnp.float32)
    be2 = jnp.zeros((FILTER_SIZE,), jnp.float32)

    # Linear (filter_size -> 1): weight (1, filter_size), scalar bias.
    wl = xavier(k3, (1, FILTER_SIZE), FILTER_SIZE, 1)
    bl = jax.random.uniform(kbl, (), jnp.float32, -0.1, 0.1)

    # Pack b1,g1,be1,b2,g2,be2 and the scalar final bias into one (32, 8) array.
    vec = jnp.stack(
        [b1, g1, be1, b2, g2, be2,
         jnp.full((FILTER_SIZE,), bl, jnp.float32),
         jnp.zeros((FILTER_SIZE,), jnp.float32)],
        axis=1)

    return (w1, w2, vec, wl)


def _ref_forward(x, params):
    """Pure-JAX reference (channel-last), used only for the correctness check."""
    w1, w2, vec, wl = params
    b1, g1, be1, b2, g2, be2 = (vec[:, i] for i in range(6))
    bl = vec[0, 6]

    def conv(h, w):                                   # w: (K, Cout, Cin), pad=1
        _, T, _ = h.shape
        hp = jnp.pad(h, ((0, 0), (PAD, PAD), (0, 0)))
        return sum(jnp.einsum("btc,dc->btd", hp[:, k:k + T, :], w[k])
                   for k in range(KERNEL_SIZE))

    def layer_norm(h, g, be):
        mu = jnp.mean(h, axis=-1, keepdims=True)
        var = jnp.mean((h - mu) ** 2, axis=-1, keepdims=True)
        return (h - mu) * jax.lax.rsqrt(var + LN_EPS) * g + be

    h = jnp.maximum(layer_norm(conv(x, w1) + b1, g1, be1), 0.0)
    h = jnp.maximum(layer_norm(conv(h, w2) + b2, g2, be2), 0.0)
    y = jnp.maximum(jnp.einsum("btc,c->bt", h, wl[0]) + bl, 0.0)
    return y[None]


if __name__ == "__main__":
    import numpy as np

    key = jax.random.PRNGKey(0)
    kx, kp = jax.random.split(key)

    B, T = 2, 16
    x = jax.random.normal(kx, (B, T, ENCODER_DIM), jnp.float32)
    params = init_params(kp)

    out = jax.block_until_ready(duration_predictor(x, params))
    ref = jax.block_until_ready(_ref_forward(x, params))

    assert out.shape == (1, B, T), out.shape
    assert out.dtype == jnp.float32
    assert bool(jnp.all(out >= 0.0))  # final ReLU
    # tolerance covers bf16 HBM storage of the activations (f32 math everywhere else)
    np.testing.assert_allclose(np.asarray(out), np.asarray(ref), rtol=3e-2, atol=3e-2)
    print("KERNEL_OK")
</pallas_src>

<mosaic_0001>
module attributes {stable_mosaic.version = 11 : i64} {
  func.func @duration_predictor_kernel(%arg0: i32, %arg1: memref<32x128xbf16, #tpu.memory_space<vmem>>, %arg2: memref<32x8xf32, #tpu.memory_space<vmem>>, %arg3: memref<3x32x32xf32, #tpu.memory_space<vmem>>, %arg4: memref<3x32x32xf32, #tpu.memory_space<vmem>>, %arg5: memref<1x32xf32, #tpu.memory_space<vmem>>, %arg6: memref<1x1x128xf32, #tpu.memory_space<vmem>>) attributes {dimension_semantics = [#tpu.dimension_semantics<parallel>], iteration_bounds = array<i64: 2>, scalar_prefetch = 0 : i64, scratch_operands = 0 : i64, tpu.core_type = #tpu.core_type<tc>, window_params = [{transform_indices = @transform_0, window_bounds = array<i64: 32, 128>}, {pipeline_mode = #tpu.pipeline_mode<synchronous>, transform_indices = @transform_1, window_bounds = array<i64: 32, 8>}, {pipeline_mode = #tpu.pipeline_mode<synchronous>, transform_indices = @transform_2, window_bounds = array<i64: 3, 32, 32>}, {pipeline_mode = #tpu.pipeline_mode<synchronous>, transform_indices = @transform_3, window_bounds = array<i64: 3, 32, 32>}, {pipeline_mode = #tpu.pipeline_mode<synchronous>, transform_indices = @transform_4, window_bounds = array<i64: 1, 32>}, {transform_indices = @transform_5, window_bounds = array<i64: 1, 1, 128>}]} {
    %c0 = arith.constant 0 : index
    %c0_0 = arith.constant 0 : index
    %0 = vector.load %arg1[%c0, %c0_0] : memref<32x128xbf16, #tpu.memory_space<vmem>>, vector<32x128xbf16>
    %1 = arith.extf %0 : vector<32x128xbf16> to vector<32x128xf32>
    %c0_1 = arith.constant 0 : index
    %c0_2 = arith.constant 0 : index
    %2 = vector.load %arg2[%c0_1, %c0_2] : memref<32x8xf32, #tpu.memory_space<vmem>>, vector<32x8xf32>
    %3 = tpu.iota {dimensions = array<i32: 1>} : vector<32x128xi32>
    %c127_i32 = arith.constant 127 : i32
    %4 = vector.broadcast %c127_i32 : i32 to vector<32x128xi32>
    %5 = arith.andi %3, %4 : vector<32x128xi32>
    %c0_i32 = arith.constant 0 : i32
    %6 = vector.broadcast %c0_i32 : i32 to vector<32x128xi32>
    %7 = arith.cmpi eq, %5, %6 : vector<32x128xi32>
    %c15_i32 = arith.constant 15 : i32
    %8 = vector.broadcast %c15_i32 : i32 to vector<32x128xi32>
    %9 = arith.cmpi sge, %5, %8 : vector<32x128xi32>
    %10 = vector.extract_strided_slice %2 {offsets = [0, 0], sizes = [32, 1], strides = [1, 1]} : vector<32x8xf32> to vector<32x1xf32>
    %11 = vector.extract_strided_slice %2 {offsets = [0, 1], sizes = [32, 1], strides = [1, 1]} : vector<32x8xf32> to vector<32x1xf32>
    %12 = vector.extract_strided_slice %2 {offsets = [0, 2], sizes = [32, 1], strides = [1, 1]} : vector<32x8xf32> to vector<32x1xf32>
    %c1_i32 = arith.constant 1 : i32
    %13 = tpu.dynamic_rotate %1 by %c1_i32 dim 1 : vector<32x128xf32>, i32 -> vector<32x128xf32>
    %cst = arith.constant 0.000000e+00 : f32
    %14 = vector.broadcast %cst : f32 to vector<32x128xf32>
    %15 = arith.select %7, %14, %13 : vector<32x128xi1>, vector<32x128xf32>
    %c127_i32_3 = arith.constant 127 : i32
    %16 = tpu.dynamic_rotate %1 by %c127_i32_3 dim 1 : vector<32x128xf32>, i32 -> vector<32x128xf32>
    %cst_4 = arith.constant 0.000000e+00 : f32
    %17 = vector.broadcast %cst_4 : f32 to vector<32x128xf32>
    %18 = arith.select %9, %17, %16 : vector<32x128xi1>, vector<32x128xf32>
    %c1 = arith.constant 1 : index
    %c0_5 = arith.constant 0 : index
    %c0_6 = arith.constant 0 : index
    %19 = vector.load %arg3[%c1, %c0_5, %c0_6] : memref<3x32x32xf32, #tpu.memory_space<vmem>>, vector<1x32x32xf32>
    %20 = vector.shape_cast %19 : vector<1x32x32xf32> to vector<32x32xf32>
    %cst_7 = arith.constant dense<0.000000e+00> : vector<32x128xf32>
    %21 = tpu.matmul %20, %1, %cst_7 {dimension_numbers = #tpu.dot_dimension_numbers<[1], [0], [0], [1], [0, 0, 1, 1], [], []>} : vector<32x32xf32>, vector<32x128xf32>, vector<32x128xf32> -> vector<32x128xf32>
    %c0_8 = arith.constant 0 : index
    %c0_9 = arith.constant 0 : index
    %c0_10 = arith.constant 0 : index
    %22 = vector.load %arg3[%c0_8, %c0_9, %c0_10] : memref<3x32x32xf32, #tpu.memory_space<vmem>>, vector<1x32x32xf32>
    %23 = vector.shape_cast %22 : vector<1x32x32xf32> to vector<32x32xf32>
    %cst_11 = arith.constant dense<0.000000e+00> : vector<32x128xf32>
    %24 = tpu.matmul %23, %15, %cst_11 {dimension_numbers = #tpu.dot_dimension_numbers<[1], [0], [0], [1], [0, 0, 1, 1], [], []>} : vector<32x32xf32>, vector<32x128xf32>, vector<32x128xf32> -> vector<32x128xf32>
    %25 = arith.addf %21, %24 : vector<32x128xf32>
    %c2 = arith.constant 2 : index
    %c0_12 = arith.constant 0 : index
    %c0_13 = arith.constant 0 : index
    %26 = vector.load %arg3[%c2, %c0_12, %c0_13] : memref<3x32x32xf32, #tpu.memory_space<vmem>>, vector<1x32x32xf32>
    %27 = vector.shape_cast %26 : vector<1x32x32xf32> to vector<32x32xf32>
    %cst_14 = arith.constant dense<0.000000e+00> : vector<32x128xf32>
    %28 = tpu.matmul %27, %18, %cst_14 {dimension_numbers = #tpu.dot_dimension_numbers<[1], [0], [0], [1], [0, 0, 1, 1], [], []>} : vector<32x32xf32>, vector<32x128xf32>, vector<32x128xf32> -> vector<32x128xf32>
    %29 = arith.addf %25, %28 : vector<32x128xf32>
    %30 = vector.broadcast %10 : vector<32x1xf32> to vector<32x128xf32>
    %31 = arith.addf %29, %30 : vector<32x128xf32>
    %cst_15 = arith.constant dense<0.000000e+00> : vector<128xf32>
    %32 = vector.multi_reduction <add>, %31, %cst_15 [0] : vector<32x128xf32> to vector<128xf32>
    %33 = vector.shape_cast %32 : vector<128xf32> to vector<1x128xf32>
    %cst_16 = arith.constant 3.200000e+01 : f32
    %34 = vector.broadcast %cst_16 : f32 to vector<1x128xf32>
    %35 = arith.divf %33, %34 : vector<1x128xf32>
    %36 = vector.broadcast %35 : vector<1x128xf32> to vector<32x128xf32>
    %37 = arith.subf %31, %36 : vector<32x128xf32>
    %38 = arith.mulf %37, %37 : vector<32x128xf32>
    %cst_17 = arith.constant dense<0.000000e+00> : vector<128xf32>
    %39 = vector.multi_reduction <add>, %38, %cst_17 [0] : vector<32x128xf32> to vector<128xf32>
    %40 = vector.shape_cast %39 : vector<128xf32> to vector<1x128xf32>
    %cst_18 = arith.constant 3.200000e+01 : f32
    %41 = vector.broadcast %cst_18 : f32 to vector<1x128xf32>
    %42 = arith.divf %40, %41 : vector<1x128xf32>
    %cst_19 = arith.constant 9.99999974E-6 : f32
    %43 = vector.broadcast %cst_19 : f32 to vector<1x128xf32>
    %44 = arith.addf %42, %43 : vector<1x128xf32>
    %45 = math.rsqrt %44 : vector<1x128xf32>
    %46 = vector.broadcast %45 : vector<1x128xf32> to vector<32x128xf32>
    %47 = arith.mulf %37, %46 : vector<32x128xf32>
    %48 = vector.broadcast %11 : vector<32x1xf32> to vector<32x128xf32>
    %49 = arith.mulf %47, %48 : vector<32x128xf32>
    %50 = vector.broadcast %12 : vector<32x1xf32> to vector<32x128xf32>
    %51 = arith.addf %49, %50 : vector<32x128xf32>
    %cst_20 = arith.constant 0.000000e+00 : f32
    %52 = vector.broadcast %cst_20 : f32 to vector<32x128xf32>
    %53 = arith.maximumf %51, %52 : vector<32x128xf32>
    %54 = vector.extract_strided_slice %2 {offsets = [0, 3], sizes = [32, 1], strides = [1, 1]} : vector<32x8xf32> to vector<32x1xf32>
    %55 = vector.extract_strided_slice %2 {offsets = [0, 4], sizes = [32, 1], strides = [1, 1]} : vector<32x8xf32> to vector<32x1xf32>
    %56 = vector.extract_strided_slice %2 {offsets = [0, 5], sizes = [32, 1], strides = [1, 1]} : vector<32x8xf32> to vector<32x1xf32>
    %c1_i32_21 = arith.constant 1 : i32
    %57 = tpu.dynamic_rotate %53 by %c1_i32_21 dim 1 : vector<32x128xf32>, i32 -> vector<32x128xf32>
    %cst_22 = arith.constant 0.000000e+00 : f32
    %58 = vector.broadcast %cst_22 : f32 to vector<32x128xf32>
    %59 = arith.select %7, %58, %57 : vector<32x128xi1>, vector<32x128xf32>
    %c127_i32_23 = arith.constant 127 : i32
    %60 = tpu.dynamic_rotate %53 by %c127_i32_23 dim 1 : vector<32x128xf32>, i32 -> vector<32x128xf32>
    %cst_24 = arith.constant 0.000000e+00 : f32
    %61 = vector.broadcast %cst_24 : f32 to vector<32x128xf32>
    %62 = arith.select %9, %61, %60 : vector<32x128xi1>, vector<32x128xf32>
    %c1_25 = arith.constant 1 : index
    %c0_26 = arith.constant 0 : index
    %c0_27 = arith.constant 0 : index
    %63 = vector.load %arg4[%c1_25, %c0_26, %c0_27] : memref<3x32x32xf32, #tpu.memory_space<vmem>>, vector<1x32x32xf32>
    %64 = vector.shape_cast %63 : vector<1x32x32xf32> to vector<32x32xf32>
    %cst_28 = arith.constant dense<0.000000e+00> : vector<32x128xf32>
    %65 = tpu.matmul %64, %53, %cst_28 {dimension_numbers = #tpu.dot_dimension_numbers<[1], [0], [0], [1], [0, 0, 1, 1], [], []>} : vector<32x32xf32>, vector<32x128xf32>, vector<32x128xf32> -> vector<32x128xf32>
    %c0_29 = arith.constant 0 : index
    %c0_30 = arith.constant 0 : index
    %c0_31 = arith.constant 0 : index
    %66 = vector.load %arg4[%c0_29, %c0_30, %c0_31] : memref<3x32x32xf32, #tpu.memory_space<vmem>>, vector<1x32x32xf32>
    %67 = vector.shape_cast %66 : vector<1x32x32xf32> to vector<32x32xf32>
    %cst_32 = arith.constant dense<0.000000e+00> : vector<32x128xf32>
    %68 = tpu.matmul %67, %59, %cst_32 {dimension_numbers = #tpu.dot_dimension_numbers<[1], [0], [0], [1], [0, 0, 1, 1], [], []>} : vector<32x32xf32>, vector<32x128xf32>, vector<32x128xf32> -> vector<32x128xf32>
    %69 = arith.addf %65, %68 : vector<32x128xf32>
    %c2_33 = arith.constant 2 : index
    %c0_34 = arith.constant 0 : index
    %c0_35 = arith.constant 0 : index
    %70 = vector.load %arg4[%c2_33, %c0_34, %c0_35] : memref<3x32x32xf32, #tpu.memory_space<vmem>>, vector<1x32x32xf32>
    %71 = vector.shape_cast %70 : vector<1x32x32xf32> to vector<32x32xf32>
    %cst_36 = arith.constant dense<0.000000e+00> : vector<32x128xf32>
    %72 = tpu.matmul %71, %62, %cst_36 {dimension_numbers = #tpu.dot_dimension_numbers<[1], [0], [0], [1], [0, 0, 1, 1], [], []>} : vector<32x32xf32>, vector<32x128xf32>, vector<32x128xf32> -> vector<32x128xf32>
    %73 = arith.addf %69, %72 : vector<32x128xf32>
    %74 = vector.broadcast %54 : vector<32x1xf32> to vector<32x128xf32>
    %75 = arith.addf %73, %74 : vector<32x128xf32>
    %cst_37 = arith.constant dense<0.000000e+00> : vector<128xf32>
    %76 = vector.multi_reduction <add>, %75, %cst_37 [0] : vector<32x128xf32> to vector<128xf32>
    %77 = vector.shape_cast %76 : vector<128xf32> to vector<1x128xf32>
    %cst_38 = arith.constant 3.200000e+01 : f32
    %78 = vector.broadcast %cst_38 : f32 to vector<1x128xf32>
    %79 = arith.divf %77, %78 : vector<1x128xf32>
    %80 = vector.broadcast %79 : vector<1x128xf32> to vector<32x128xf32>
    %81 = arith.subf %75, %80 : vector<32x128xf32>
    %82 = arith.mulf %81, %81 : vector<32x128xf32>
    %cst_39 = arith.constant dense<0.000000e+00> : vector<128xf32>
    %83 = vector.multi_reduction <add>, %82, %cst_39 [0] : vector<32x128xf32> to vector<128xf32>
    %84 = vector.shape_cast %83 : vector<128xf32> to vector<1x128xf32>
    %cst_40 = arith.constant 3.200000e+01 : f32
    %85 = vector.broadcast %cst_40 : f32 to vector<1x128xf32>
    %86 = arith.divf %84, %85 : vector<1x128xf32>
    %cst_41 = arith.constant 9.99999974E-6 : f32
    %87 = vector.broadcast %cst_41 : f32 to vector<1x128xf32>
    %88 = arith.addf %86, %87 : vector<1x128xf32>
    %89 = math.rsqrt %88 : vector<1x128xf32>
    %90 = vector.broadcast %89 : vector<1x128xf32> to vector<32x128xf32>
    %91 = arith.mulf %81, %90 : vector<32x128xf32>
    %92 = vector.broadcast %55 : vector<32x1xf32> to vector<32x128xf32>
    %93 = arith.mulf %91, %92 : vector<32x128xf32>
    %94 = vector.broadcast %56 : vector<32x1xf32> to vector<32x128xf32>
    %95 = arith.addf %93, %94 : vector<32x128xf32>
    %cst_42 = arith.constant 0.000000e+00 : f32
    %96 = vector.broadcast %cst_42 : f32 to vector<32x128xf32>
    %97 = arith.maximumf %95, %96 : vector<32x128xf32>
    %c0_43 = arith.constant 0 : index
    %c0_44 = arith.constant 0 : index
    %98 = vector.load %arg5[%c0_43, %c0_44] : memref<1x32xf32, #tpu.memory_space<vmem>>, vector<1x32xf32>
    %cst_45 = arith.constant dense<0.000000e+00> : vector<1x128xf32>
    %99 = tpu.matmul %98, %97, %cst_45 {dimension_numbers = #tpu.dot_dimension_numbers<[1], [0], [0], [1], [0, 0, 1, 1], [], []>} : vector<1x32xf32>, vector<32x128xf32>, vector<1x128xf32> -> vector<1x128xf32>
    %100 = vector.extract_strided_slice %2 {offsets = [0, 6], sizes = [1, 1], strides = [1, 1]} : vector<32x8xf32> to vector<1x1xf32>
    %101 = vector.broadcast %100 : vector<1x1xf32> to vector<1x128xf32>
    %102 = arith.addf %99, %101 : vector<1x128xf32>
    %cst_46 = arith.constant 0.000000e+00 : f32
    %103 = vector.broadcast %cst_46 : f32 to vector<1x128xf32>
    %104 = arith.maximumf %102, %103 : vector<1x128xf32>
    %c0_47 = arith.constant 0 : index
    %c0_48 = arith.constant 0 : index
    %c0_49 = arith.constant 0 : index
    %105 = vector.load %arg6[%c0_47, %c0_48, %c0_49] : memref<1x1x128xf32, #tpu.memory_space<vmem>>, vector<1x1x128xf32>
    %106 = vector.shape_cast %105 : vector<1x1x128xf32> to vector<1x128xf32>
    %107 = vector.shape_cast %104 : vector<1x128xf32> to vector<1x1x128xf32>
    tpu.vector_store %arg6[%c0_47, %c0_48, %c0_49], %107 {strides = array<i32>} : memref<1x1x128xf32, #tpu.memory_space<vmem>>, vector<1x1x128xf32>,
    return
  }
  func.func @transform_0(%arg0: i32) -> (i32, i32) {
    %c0_i32 = arith.constant 0 : i32
    %c0_i32_0 = arith.constant 0 : i32
    return %c0_i32, %arg0 : i32, i32
  }
  func.func @transform_1(%arg0: i32) -> (i32, i32) {
    %c0_i32 = arith.constant 0 : i32
    %c0_i32_0 = arith.constant 0 : i32
    %c0_i32_1 = arith.constant 0 : i32
    return %c0_i32, %c0_i32_0 : i32, i32
  }
  func.func @transform_2(%arg0: i32) -> (i32, i32, i32) {
    %c0_i32 = arith.constant 0 : i32
    %c0_i32_0 = arith.constant 0 : i32
    %c0_i32_1 = arith.constant 0 : i32
    %c0_i32_2 = arith.constant 0 : i32
    return %c0_i32, %c0_i32_0, %c0_i32_1 : i32, i32, i32
  }
  func.func @transform_3(%arg0: i32) -> (i32, i32, i32) {
    %c0_i32 = arith.constant 0 : i32
    %c0_i32_0 = arith.constant 0 : i32
    %c0_i32_1 = arith.constant 0 : i32
    %c0_i32_2 = arith.constant 0 : i32
    return %c0_i32, %c0_i32_0, %c0_i32_1 : i32, i32, i32
  }
  func.func @transform_4(%arg0: i32) -> (i32, i32) {
    %c0_i32 = arith.constant 0 : i32
    %c0_i32_0 = arith.constant 0 : i32
    %c0_i32_1 = arith.constant 0 : i32
    return %c0_i32, %c0_i32_0 : i32, i32
  }
  func.func @transform_5(%arg0: i32) -> (i32, i32, i32) {
    %c0_i32 = arith.constant 0 : i32
    %c0_i32_0 = arith.constant 0 : i32
    %c0_i32_1 = arith.constant 0 : i32
    return %arg0, %c0_i32, %c0_i32_0 : i32, i32, i32
  }
}

</mosaic_0001>

<bundles_post_ra>
// kernel: tpu_custom_call.1
= control target key start
LH: loop header
LB: loop body
LE: loop exit
PB: predicated region body
PF: predicated region fallthrough
CT: control target
= control target key end

     0   :  { %10 = vsyncpa [#allocation4], 0  ;;  %s2315_s0 = inlined_call_operand.vmem [shape: bf16[32,256], index: 0, kind: input, shape index: {}]   ;;  %s2316_s1 = inlined_call_operand.vmem [shape: f32[32,8], index: 1, kind: input, shape index: {}]   ;;  %s2317_s2 = inlined_call_operand.hbm [shape: f32[3,32,32], index: 2, kind: input, shape index: {}]   ;;  %s2318_s3 = inlined_call_operand.hbm [shape: f32[3,32,32], index: 3, kind: input, shape index: {}]   ;;  %s2319_s4 = inlined_call_operand.vmem [shape: f32[1,32], index: 4, kind: input, shape index: {}]   ;;  %s2320_s5 = inlined_call_operand.hbm [shape: f32[2,1,128], index: 5, kind: output, shape index: {}]  }
   0x1   :  { %11 = vsyncpa [#allocation7], 0 }
   0x2   :  { %12 = vsyncpa [#allocation5], 0 }
   0x3   :  { %14 = vsyncpa [#allocation5 + $0x1], 0  ;;  %s1992_s18 = smov 0   ;;  %s1994_s19 = smov 0  }
   0x4   :  { %s1996_s20 = smov 0   ;;  %s1998_s21 = smov 0  }
   0x5 LB: > { %s2013_s22 = sadd.s32 4294967295, %s1943_s21   ;;  %s1366_s23 = sadd.s32 4294967294, %s1943_s21   ;;  %s1943_s21 = sphi %s1998_s21, %s2344_s21   ;;  %s1939_s20 = sphi %s1996_s20, %s2343_s20   ;;  %s1935_s19 = sphi %s1994_s19, %s2342_s19   ;;  %s1931_s18 = sphi %s1992_s18, %s2341_s18  }
   0x6   : > { %s2017_s24 = sadd.s32 1, %s1943_s21   ;;  %s27_s25 = sadd.s32 1, %s1939_s20 }
   0x7   : > { %s24_s26 = ssub.s32 %s1943_s21, %s2017_s24  ;;  %p34_p0 = scmp.ne.s32.totalorder %s1939_s20, %s1935_s19 }
   0x8   : > { %p25_p1 = scmp.eq.s32.totalorder %s24_s26, 0  ;;  %p35_p2 = scmp.eq.s32.totalorder %s1943_s21, 0 }
   0x9   : > { %p148_p3 = scmp.eq.s32.totalorder %s2013_s22, 1  ;;  %p153_p4 = scmp.ne.s32.totalorder %s1935_s19, %s1931_s18 }
   0xa   : > { %s2029_s27 = scalar_select %p25_p1, %s1939_s20, %s27_s25  }
   0xb   : > { %p2031_p5 = por %p35_p2, %p34_p0  ;;  %p2035_p6 = por %p148_p3, %p34_p0 }
   0xc   : > { %p154_p7 = scmp.eq.s32.totalorder %s1366_s23, 1  ;;  %p1367_p8 = scmp.ge.s32.totalorder %s1943_s21, 1 }
   0xd   : > { %s2324_s28 = scalar_select %p2031_p5, 1, 0 }
   0xe   : > { %s2325_s29 = scalar_select %p2035_p6, 1, 0 }
   0xf   : > { %p161_p9 = scmp.lt.s32.totalorder %s1943_s21, 3  ;;  %p2041_p10 = por %p154_p7, %p153_p4 }
  0x10   : > { %p2321_p11 = scmp.eq.s32.totalorder %s2013_s22, 0  ;;  %s1945_s7 = smov [#allocation3]  }
  0x11   : > { %s2326_s30 = scalar_select %p2041_p10, 1, 0 }
  0x12   : > { %p2046_p12 = pnand %p1367_p8, %p161_p9  ;;  %s176_s8 = sshll.u32 %s1945_s7, 4  ;;  %s177_s8 = int_to_ptr.vmem [resolvable:$true] %s176_s8 }
  0x13   : > { %s1946_s10 = smov [#allocation6]   ;;  %s1817_s14 = scalar_lea.hbm %s2317_s2, 1536 }
  0x14   : > { %s2327_s6 = scalar_select %p2046_p12, 1, 0 }
  0x15   : > { %p1692_p13 = pneg %p2046_p12  ;;  %s189_s11 = sshll.u32 %s1946_s10, 4  ;;  %s2058_s11 = int_to_ptr.vmem [resolvable:$true] %s189_s11 }
  0x16   : > { %p1818_p1 = scmp.ne.s32.totalorder %s2317_s2, %s1817_s14  ;;  %p1824_p7 = scmp.lt.u32.totalorder %s1817_s14, %s2317_s2 }
  0x17   : > { %p2054_p0 = pnand %p2321_p11, %p1692_p13 }
  0x19   : > { %p1819_p2 = pneg %p2054_p0 }
  0x1b   : > { %p1820_p3 = pnand %p1819_p2, %p1818_p1 }
  0x1d   : > { %p1821_p4 = pneg %p1820_p3 }
  0x1f   : > { %p1826_p8 = pnand %p1824_p7, %p1821_p4 }
  0x21   : > { %1829 = shalt.err (!%p1826_p8)
}
  0x22   : > { %s1830_s25 = scalar_lea.vmem %s177_s8, 1536  ;;  %p1838_p10 = scmp.lt.s32.totalorder %s177_s8, %s177_s8 }
  0x23   : > { %p1831_p9 = scmp.ne.s32.totalorder %s177_s8, %s1830_s25  ;;  %p1839_p6 = scmp.lt.s32.totalorder %s1830_s25, %s1830_s25 }
  0x25   : > { %p1833_p13 = pnand %p1831_p9, %p1819_p2  ;;  %p1840_p12 = por %p1839_p6, %p1838_p10 }
  0x27   : > { %p1834_p11 = pneg %p1833_p13 }
  0x29   : > { %p1841_p5 = pnand %p1840_p12, %p1834_p11 }
  0x2b   : > { %1844 = shalt.err (!%p1841_p5)
}
  0x2c   : > { %s1947_s26 = smov 128   ;;  %s1948_s7 = smov 8  }
  0x2d   : > { %1695 = dma.hbm_to_vmem [thread:$0]  (!%p2054_p0), %s2317_s2, 1536, %s177_s8, [#allocation4], %s1947_s26, %s1947_s26, %s1948_s7  }
  0x2e   : > { %s1845_s15 = scalar_lea.hbm %s2318_s3, 1536 }
  0x2f   : > { %p1846_p1 = scmp.ne.s32.totalorder %s2318_s3, %s1845_s15  ;;  %p1852_p10 = scmp.lt.u32.totalorder %s1845_s15, %s2318_s3 }
  0x31   : > { %p1848_p5 = pnand %p1846_p1, %p1819_p2 }
  0x33   : > { %p1849_p6 = pneg %p1848_p5 }
  0x35   : > { %p1854_p11 = pnand %p1852_p10, %p1849_p6 }
  0x37   : > { %1857 = shalt.err (!%p1854_p11)
}
  0x38   : > { %s1858_s8 = scalar_lea.vmem %s2058_s11, 1536  ;;  %p1866_p7 = scmp.lt.s32.totalorder %s2058_s11, %s2058_s11 }
  0x39   : > { %p1859_p12 = scmp.ne.s32.totalorder %s2058_s11, %s1858_s8  ;;  %p1867_p8 = scmp.lt.s32.totalorder %s1858_s8, %s1858_s8 }
  0x3b   : > { %p1861_p3 = pnand %p1859_p12, %p1819_p2  ;;  %p1868_p9 = por %p1867_p8, %p1866_p7 }
  0x3d   : > { %p1862_p4 = pneg %p1861_p3 }
  0x3f   : > { %p1869_p13 = pnand %p1868_p9, %p1862_p4 }
  0x41   : > { %1872 = shalt.err (!%p1869_p13)
}
  0x42   : > { %1698 = dma.hbm_to_vmem [thread:$0]  (!%p2054_p0), %s2318_s3, 1536, %s2058_s11, [#allocation7], %s1947_s26, %s1947_s26, %s1948_s7  }
  0x43   : > { %p1370_p1 = scmp.ge.s32.totalorder %s1943_s21, 2 }
  0x44   : > { %p2329_p2 = scmp.ne.s32.totalorder (!%p1370_p1), %s2324_s28, 0 }
  0x45   : > { %202 = sbr.rel (%p1370_p1) target bundleno = 83 (0x53), region = 32 }
  0x4c   : > { %205 = sbr.rel (!%p2329_p2) target bundleno = 83 (0x53), region = 36  ;;  %s207_s13 = sand.u32 (%p2329_p2), 1, %s1939_s20  }
  0x4d   : > { %s1372_s14 = sshll.u32 (%p2329_p2), %s1943_s21, 2  ;;  %s1371_s15 = sshll.u32 (%p2329_p2), %s207_s13, 4 }
  0x4e   : > { %s211_s17 = scalar_lea.vmem (%p2329_p2), %s2315_s0, %s1372_s14  ;;  %s209_s11 = scalar_lea.vmem (%p2329_p2), [#allocation2], %s1371_s15 }
  0x4f   : > { %v227_v0 = vld [vmem:[%s211_s17] sm:$0xf] (%p2329_p2)  ;;  %v229_v1 = vld [vmem:[%s211_s17 + $0x8] sm:$0xf] (%p2329_p2)  ;;  %v231_v2 = vld [vmem:[%s211_s17 + $0x10] sm:$0xf] (%p2329_p2) }
  0x50   : > { %228 = vst [vmem:[%s209_s11] sm:$0xf] (%p2329_p2), %v227_v0  ;;  %230 = vst [vmem:[%s209_s11 + $0x4] sm:$0xf] (%p2329_p2), %v229_v1  ;;  %v233_v3 = vld [vmem:[%s211_s17 + $0x18] sm:$0xf] (%p2329_p2) }
  0x51   : > { %232 = vst [vmem:[%s209_s11 + $0x8] sm:$0xf] (%p2329_p2), %v231_v2  ;;  %234 = vst [vmem:[%s209_s11 + $0xc] sm:$0xf] (%p2329_p2), %v233_v3 }
  0x53 PF: > { %p2330_p0 = scmp.ne.s32.totalorder %s2327_s6, 0 }
  0x54   : > { %s2120_s28 = sand.u32 (!%p2330_p0), 1, %s1935_s19   ;;  %p2331_p5 = scmp.eq.s32.totalorder (!%p2330_p0), %s2013_s22, 0 }
  0x55   : > { %268 = sbr.rel (%p2330_p0) target bundleno = 1192 (0x4a8), region = 77  ;;  %s1374_s26 = sshll.u32 (!%p2330_p0), %s2120_s28, 4 }
  0x56   : > { %s273_s7 = scalar_lea.vmem (!%p2330_p0), [#allocation2], %s1374_s26 }
  0x5c   : > { %1918 = dma.done.wait (%p2331_p5), [#allocation4], 1536   ;;  %p2332_p6 = pmov %p2331_p5 }
  0x5d   : > { %p2333_p10 = pmov %p2331_p5 }
  0x5e   : > { %1920 = vsyncadd (%p2332_p6), [#allocation4], 4294965760 }
  0x5f   : > { %1922 = dma.done.wait (%p2333_p10), [#allocation7], 1536   ;;  %p2334_p11 = pmov %p2331_p5 }
  0x60   : > { %v2131_v4 = vld [vmem:[%s273_s7] sm:$0xff]   ;;  %v2133_v5 = vld [vmem:[%s273_s7 + $0x8] sm:$0xff]   ;;  %vm355_vm0 = vcmask 261120   ;;  %s1949_s6 = smov 1   ;;  %s1950_s23 = smov 127   ;;  %v1951_v15 = vmov 0   ;;  %v317_v20 = vlaneseq }
  0x61   : > { %1924 = vsyncadd (%p2334_p11), [#allocation7], 4294965760  ;;  %v1439_v6 = vunpack.c.l.bf16 %v2131_v4  ;;  %v1440_v7 = vunpack.c.h.bf16 %v2131_v4  ;;  %v1443_v8 = vunpack.c.l.bf16 %v2133_v5  ;;  %v1444_v9 = vunpack.c.h.bf16 %v2133_v5  ;;  %v351_v10 = vld [vmem:[#allocation3] sm:$0xff]  ;;  %v2147_v13 = vld [vmem:[%s2316_s1 + $0x8] sm:$0xff]  ;;  %1777 = vset.pattern.permute.xlu1 %v1951_v15  ;;  %1776 = vset.pattern.permute.xlu0 %v1951_v15  ;;  %s1434_s11 = sshll.u32 %s2013_s22, 4  ;;  %s304_s26 = scalar_lea.vmem [#allocation8], %s2120_s28 }
  0x62   : > { %1509 = vmatprep.mubr.msk.f32.mxu0 %vm355_vm0, %v351_v10  ;;  %v2152_v14 = vld [vmem:[%s2316_s1] sm:$0xff]  ;;  %v2159_v16 = vld [vmem:[%s2316_s1 + $0x10] sm:$0xff]  ;;  %v2164_v17 = vld [vmem:[%s2316_s1 + $0x18] sm:$0xff]  ;;  %v1952_v18 = vmov 1   ;;  %v1953_v19 = vmov 2   ;;  %v318_v21 = vand.u32 127, %v317_v20  ;;  %s2271_s25 = scalar_lea.hbm %s2320_s5, %s1434_s11 }
  0x63   : > { %v1756_v11 = vpack.i.bf16 %v1440_v7, %v1439_v6  ;;  %v1761_v12 = vpack.i.bf16 %v1444_v9, %v1443_v8  ;;  %v352_v32 = vld [vmem:[#allocation3 + $0x8] sm:$0xff]  ;;  %v353_v35 = vld [vmem:[#allocation3 + $0x10] sm:$0xff]  ;;  %v354_v37 = vld [vmem:[#allocation3 + $0x18] sm:$0xff]  ;;  %vm1958_vm5 = vmmov 0   ;;  %s1283_s7 = sshll.u32 %s304_s26, 4  ;;  %s1271_s8 = scalar_lea.sflag [#allocation5], %s2120_s28  ;;  %s2273_s7 = int_to_ptr.vmem [resolvable:$true] %s1283_s7 }
  0x64   : > { %vm1446_vm1 = vcmp.ne.s32.totalorder %v318_v21, 0  ;;  %vm1447_vm3 = vcmp.lt.s32.totalorder %v318_v21, 15  ;;  %v347_v41 = vld [vmem:[#allocation3 + $0x20] sm:$0xff]  ;;  %v348_v43 = vld [vmem:[#allocation3 + $0x28] sm:$0xff]  ;;  %v349_v45 = vld [vmem:[#allocation3 + $0x30] sm:$0xff]  ;;  %s1873_s10 = scalar_lea.vmem %s2273_s7, 16 }
  0x65   : > { %1757 = vrot.lane.b32.xlu0 %v1756_v11, %s1949_s6  ;;  %1767 = vrot.lane.b32.xlu1 %v1756_v11, %s1950_s23  ;;  %vm2176_vm2 = vmpackc.low %vm1446_vm1, %vm1446_vm1  ;;  %v350_v46 = vld [vmem:[#allocation3 + $0x38] sm:$0xff]  ;;  %v551_v47 = vld [vmem:[#allocation3 + $0x40] sm:$0xff]  ;;  %p1874_p12 = scmp.ne.s32.totalorder %s2273_s7, %s1873_s10  ;;  %p2339_p3 = scmp.ne.s32.totalorder %s2325_s29, 0 }
  0x66   : > { %vm2193_vm4 = vmpackc.low %vm1447_vm3, %vm1447_vm3  ;;  %v552_v48 = vld [vmem:[#allocation3 + $0x48] sm:$0xff]  ;;  %v553_v49 = vld [vmem:[#allocation3 + $0x50] sm:$0xff]  ;;  %s1961_s22 = smov [#allocation8]  }
  0x67   : > { %v554_v50 = vld [vmem:[#allocation3 + $0x58] sm:$0xff]  ;;  %v785_v25 = vld [vmem:[#allocation6 + $0x28] sm:$0xff]  ;;  %p1875_p4 = pnand %p1874_p12, %p2339_p3  ;;  %s1877_s12 = sshll.u32 %s1961_s22, 4  ;;  %s1878_s12 = int_to_ptr.vmem [resolvable:$false] %s1877_s12 }
  0x68   : > { %s1879_s13 = scalar_lea.vmem %s1878_s12, 32  ;;  %p1880_p8 = scmp.lt.s32.totalorder %s2273_s7, %s1878_s12 }
  0x69   : > { %1762 = vrot.lane.b32.xlu0 %v1761_v12, %s1949_s6  ;;  %1772 = vrot.lane.b32.xlu1 %v1761_v12, %s1950_s23  ;;  %p1876_p7 = pneg %p1875_p4  ;;  %p1881_p9 = scmp.lt.s32.totalorder %s1879_s13, %s1873_s10 }
  0x6b   : > { %p1882_p13 = por %p1881_p9, %p1880_p8 }
  0x6d   : > { %663 = vperm.xlu1 %1777, %v2147_v13   ;;  %658 = vperm.xlu0 %1776, %v2152_v14   ;;  %p1883_p2 = pnand %p1882_p13, %p1876_p7 }
  0x71   : > { %668 = vperm.xlu1 %1777, %v2159_v16   ;;  %673 = vperm.xlu0 %1776, %v2164_v17  }
  0x75   : > { %1778 = vset.pattern.permute.xlu1 %v1952_v18  ;;  %1779 = vset.pattern.permute.xlu0 %v1952_v18 }
  0x76   : > { %716 = vperm.xlu1 %1778, %v2152_v14   ;;  %720 = vperm.xlu0 %1779, %v2147_v13  }
  0x7a   : > { %1780 = vset.pattern.permute.xlu1 %v1953_v19  ;;  %724 = vperm.xlu0 %1779, %v2159_v16  }
  0x7b   : > { %736 = vperm.xlu1 %1780, %v2152_v14  }
  0x7e   : > { %1782 = vset.pattern.permute.xlu0 %v1953_v19 }
  0x7f   : > { %740 = vperm.xlu1 %1780, %v2147_v13   ;;  %744 = vperm.xlu0 %1782, %v2159_v16  }
  0x83   : > { %1781 = vset.pattern.permute.xlu1 %v1952_v18 }
  0x84   : > { %728 = vperm.xlu1 %1781, %v2164_v17  }
  0x88   : > { %1783 = vset.pattern.permute.xlu1 %v1953_v19 }
  0x89   : > { %748 = vperm.xlu1 %1783, %v2164_v17  }
  0xd7   : > { %v1758_v22 = vpop.permute.xlu0 %1757  ;;  %v1768_v30 = vpop.permute.xlu1 %1767 }
  0xd8   : > { %v1760_v23 = vunpack.i.h.bf16 %v1758_v22  ;;  %v1759_v24 = vunpack.i.l.bf16 %v1758_v22  ;;  %v1770_v33 = vunpack.i.h.bf16 %v1768_v30  ;;  %v1769_v34 = vunpack.i.l.bf16 %v1768_v30 }
  0xda   : > { %v1596_v26 = vpack.c.bf16 %v1760_v23, %v1759_v24  ;;  %v1616_v38 = vpack.c.bf16 %v1770_v33, %v1769_v34 }
  0xdb   : > { %v1763_v27 = vpop.permute.xlu0 %1762  ;;  %v1773_v36 = vpop.permute.xlu1 %1772 }
  0xdc   : > { %v1765_v28 = vunpack.i.h.bf16 %v1763_v27  ;;  %v1764_v29 = vunpack.i.l.bf16 %v1763_v27  ;;  %1598 = vmatprep.subr.msk.bf16.mxu0 %vm2176_vm2, %v1596_v26  ;;  %v1775_v39 = vunpack.i.h.bf16 %v1773_v36  ;;  %v1774_v40 = vunpack.i.l.bf16 %v1773_v36 }
  0xdd   : > { %1601 = vmatpush3.bf16.msk.msra.mxu0 %vm2176_vm2, %v1596_v26 }
  0xde   : > { %v1602_v31 = vpack.c.bf16 %v1765_v28, %v1764_v29  ;;  %v1622_v44 = vpack.c.bf16 %v1775_v39, %v1774_v40 }
  0xe0   : > { %1604 = vmatprep.subr.msk.bf16.mxu0 %vm2176_vm2, %v1602_v31 }
  0xe1   : > { %1607 = vmatpush3.bf16.msk.msra.mxu0 %vm2176_vm2, %v1602_v31 }
  0xe2   : > { %1609 = vmatprep.subr.bf16.mxu0 %v2131_v4 }
  0xe4   : > { %1510 = vmatmul.mubr.msk.f32.vlgmr.msra.gmra.mrb[0].mxu0 %vm355_vm0, %v352_v32 }
  0xe5   : > { %1611 = vmatpush3.bf16.msra.mxu0 %v2131_v4  ;;  %1512 = vmatprep.mubr.msk.f32.mxu0 %vm355_vm0, %v353_v35 }
  0xe6   : > { %1613 = vmatprep.subr.bf16.mxu0 %v2133_v5 }
  0xe8   : > { %1513 = vmatmul.mubr.msk.f32.gmra.mrb[2].mxu0 %vm355_vm0, %v354_v37 }
  0xe9   : > { %1615 = vmatpush3.bf16.msra.mxu0 %v2133_v5  ;;  %1523 = vmatprep.mubr.msk.f32.mxu0 %vm355_vm0, %v347_v41 }
  0xea   : > { %1618 = vmatprep.subr.msk.bf16.mxu0 %vm2193_vm4, %v1616_v38 }
  0xec   : > { %1524 = vmatmul.mubr.msk.f32.vlgmr.msra.gmra.mrb[0].mxu0 %vm355_vm0, %v348_v43  ;;  %v664_v51 = vpop.permute.xlu1 %663  ;;  %v659_v52 = vpop.permute.xlu0 %658 }
  0xed   : > { %1621 = vmatpush3.bf16.msk.msra.mxu0 %vm2193_vm4, %v1616_v38  ;;  %1526 = vmatprep.mubr.msk.f32.mxu0 %vm355_vm0, %v349_v45 }
  0xee   : > { %1624 = vmatprep.subr.msk.bf16.mxu0 %vm2193_vm4, %v1622_v44 }
  0xf0   : > { %1527 = vmatmul.mubr.msk.f32.gmra.mrb[2].mxu0 %vm355_vm0, %v350_v46  ;;  %v669_v57 = vpop.permute.xlu1 %668  ;;  %v674_v60 = vpop.permute.xlu0 %673 }
  0xf1   : > { %1627 = vmatpush3.bf16.msk.msra.mxu0 %vm2193_vm4, %v1622_v44  ;;  %1537 = vmatprep.mubr.msk.f32.mxu0 %vm355_vm0, %v551_v47 }
  0xf4   : > { %1538 = vmatmul.mubr.msk.f32.vlgmr.msra.gmra.mrb[0].mxu0 %vm355_vm0, %v552_v48 }
  0xf5   : > { %1540 = vmatprep.mubr.msk.f32.mxu0 %vm355_vm0, %v553_v49  ;;  %v717_v28 = vpop.permute.xlu1 %716  ;;  %v721_v35 = vpop.permute.xlu0 %720 }
  0xf8   : > { %1541 = vmatmul.mubr.msk.f32.gmra.mrb[2].mxu0 %vm355_vm0, %v554_v50 }
  0xf9   : > { %v725_v37 = vpop.permute.xlu0 %724 }
  0xfa   : > { %v737_v33 = vpop.permute.xlu1 %736 }
  0xfe   : > { %v741_v36 = vpop.permute.xlu1 %740  ;;  %v745_v46 = vpop.permute.xlu0 %744 }
 0x103   : > { %v729_v38 = vpop.permute.xlu1 %728 }
 0x108   : > { %v749_v45 = vpop.permute.xlu1 %748 }
 0x1c7   : > { %v1539_v53 = vpop.f32.mrb[0].mxu0 }
 0x1c8   : > { %v677_v54 = vadd.f32 %v1539_v53, %v664_v51  ;;  %v633_v55 = vpop.f32.mrb[1].mxu0 }
 0x1c9   : > { %v676_v56 = vadd.f32 %v659_v52, %v633_v55 }
 0x1cb   : > { %v680_v58 = vadd.f32 %v677_v54, %v676_v56  ;;  %v1542_v59 = vpop.f32.mrb[2].mxu0 }
 0x1cc   : > { %v643_v61 = vpop.f32.mrb[3].mxu0  ;;  %v679_v63 = vadd.f32 %v1542_v59, %v674_v60  ;;  %v788_v59 = vld [vmem:[#allocation6] sm:$0xff] }
 0x1cd   : > { %v678_v62 = vadd.f32 %v669_v57, %v643_v61  ;;  %1551 = vmatprep.mubr.msk.f32.mxu1 %vm355_vm0, %v788_v59 }
 0x1cf   : > { %v681_v0 = vadd.f32 %v680_v58, %v678_v62 }
 0x1d1   : > { %v682_v1 = vadd.f32 %v681_v0, %v679_v63  ;;  %v1954_v0 = vmov 3  }
 0x1d2   : > { %1804 = vset.pattern.permute.xlu1 %v1954_v0  ;;  %1805 = vset.pattern.permute.xlu0 %v1954_v0 }
 0x1d3   : > { %v683_v2 = vrot.slane %v682_v1, 4 }
 0x1d5   : > { %v684_v3 = vadd.f32 %v683_v2, %v682_v1  ;;  %v1955_v1 = vmov 4   ;;  %v1956_v2 = vmov 5  }
 0x1d7   : > { %v685_v4 = vrot.slane %v684_v3, 2 }
 0x1d9   : > { %v686_v5 = vadd.f32 %v685_v4, %v684_v3 }
 0x1db   : > { %v687_v6 = vrot.slane %v686_v5, 1 }
 0x1dd   : > { %v688_v7 = vadd.f32 %v687_v6, %v686_v5 }
 0x1df   : > { %v690_v8 = vmul.f32 0.03125, %v688_v7 }
 0x1e1   : > { %v693_v9 = vsub.f32 %v678_v62, %v690_v8  ;;  %v694_v10 = vsub.f32 %v679_v63, %v690_v8  ;;  %v691_v11 = vsub.f32 %v676_v56, %v690_v8  ;;  %v692_v12 = vsub.f32 %v677_v54, %v690_v8 }
 0x1e3   : > { %v695_v15 = vmul.f32 %v691_v11, %v691_v11  ;;  %v696_v18 = vmul.f32 %v692_v12, %v692_v12  ;;  %v697_v19 = vmul.f32 %v693_v9, %v693_v9  ;;  %v698_v21 = vmul.f32 %v694_v10, %v694_v10 }
 0x1e5   : > { %v699_v20 = vadd.f32 %v696_v18, %v695_v15  ;;  %v791_v18 = vld [vmem:[#allocation6 + $0x18] sm:$0xff] }
 0x1e7   : > { %v700_v22 = vadd.f32 %v699_v20, %v697_v19  ;;  %v784_v19 = vld [vmem:[#allocation6 + $0x20] sm:$0xff] }
 0x1e9   : > { %v701_v23 = vadd.f32 %v700_v22, %v698_v21 }
 0x1eb   : > { %v702_v24 = vrot.slane %v701_v23, 4 }
 0x1ed   : > { %v703_v26 = vadd.f32 %v702_v24, %v701_v23  ;;  %v786_v23 = vld [vmem:[#allocation6 + $0x30] sm:$0xff] }
 0x1ef   : > { %v704_v27 = vrot.slane %v703_v26, 2 }
 0x1f1   : > { %v705_v29 = vadd.f32 %v704_v27, %v703_v26  ;;  %v787_v26 = vld [vmem:[#allocation6 + $0x38] sm:$0xff]  ;;  %v987_v27 = vld [vmem:[#allocation6 + $0x40] sm:$0xff] }
 0x1f3   : > { %v706_v30 = vrot.slane %v705_v29, 1 }
 0x1f5   : > { %v707_v31 = vadd.f32 %v706_v30, %v705_v29  ;;  %v989_v29 = vld [vmem:[#allocation6 + $0x50] sm:$0xff]  ;;  %v990_v30 = vld [vmem:[#allocation6 + $0x58] sm:$0xff] }
 0x1f7   : > { %v708_v32 = vmul.f32 0.03125, %v707_v31  ;;  %v1957_v31 = vmov 0.0|0.0  }
 0x1f8   : > { %1660 = vmatprep.subr.bf16.mxu0 %v1957_v31 }
 0x1f9   : > { %v709_v34 = vadd.f32 1e-05, %v708_v32  ;;  %v1959_v32 = vmov 0.0  }
 0x1fa   : > { %1593 = vmatprep.mubr.msk.f32.mxu0 %vm1958_vm5, %v1959_v32 }
 0x1fb   : > { %1813 = vrsqrt.f32 %v709_v34 }
 0x205   : > { %v1814_v39 = vpop.eup %1813 }
 0x206   : > { %v711_v40 = vmul.f32 %v1814_v39, %v691_v11  ;;  %v712_v41 = vmul.f32 %v1814_v39, %v692_v12  ;;  %v713_v43 = vmul.f32 %v1814_v39, %v693_v9  ;;  %v714_v44 = vmul.f32 %v1814_v39, %v694_v10  ;;  %v790_v10 = vld [vmem:[#allocation6 + $0x10] sm:$0xff] }
 0x208   : > { %v731_v47 = vmul.f32 %v717_v28, %v711_v40  ;;  %v732_v48 = vmul.f32 %v721_v35, %v712_v41  ;;  %v733_v49 = vmul.f32 %v725_v37, %v713_v43  ;;  %v734_v50 = vmul.f32 %v729_v38, %v714_v44  ;;  %v988_v28 = vld [vmem:[#allocation6 + $0x48] sm:$0xff] }
 0x20a   : > { %v751_v51 = vadd.f32 %v737_v33, %v731_v47  ;;  %v752_v52 = vadd.f32 %v741_v36, %v732_v48  ;;  %v754_v53 = vadd.f32 %v749_v45, %v734_v50  ;;  %v753_v54 = vadd.f32 %v745_v46, %v733_v49 }
 0x20b   : > { %v1960_v33 = vmov 6  }
 0x20c   : > { %v755_v55 = vmax.f32 %v751_v51, 0.0  ;;  %v756_v56 = vmax.f32 %v752_v52, 0.0  ;;  %v758_v57 = vmax.f32 %v754_v53, 0.0  ;;  %v757_v58 = vmax.f32 %v753_v54, 0.0 }
 0x20e   : > { %v1789_v60 = vpack.i.bf16 %v758_v57, %v757_v58  ;;  %v1784_v61 = vpack.i.bf16 %v756_v56, %v755_v55  ;;  %v1640_v62 = vpack.c.bf16 %v756_v56, %v755_v55  ;;  %v1644_v63 = vpack.c.bf16 %v758_v57, %v757_v58 }
 0x210   : > { %1790 = vrot.lane.b32.xlu0 %v1789_v60, %s1949_s6  ;;  %1785 = vrot.lane.b32.xlu1 %v1784_v61, %s1949_s6 }
 0x214   : > { %1800 = vrot.lane.b32.xlu0 %v1789_v60, %s1950_s23  ;;  %1795 = vrot.lane.b32.xlu1 %v1784_v61, %s1950_s23 }
 0x218   : > { %1093 = vperm.xlu1 %1804, %v2152_v14   ;;  %1097 = vperm.xlu0 %1805, %v2147_v13  }
 0x21c   : > { %1101 = vperm.xlu1 %1804, %v2159_v16   ;;  %1806 = vset.pattern.permute.xlu0 %v1955_v1 }
 0x21d   : > { %1147 = vperm.xlu0 %1806, %v2152_v14  }
 0x220   : > { %1105 = vperm.xlu1 %1804, %v2164_v17  }
 0x221   : > { %1809 = vset.pattern.permute.xlu0 %v1956_v2 }
 0x222   : > { %1171 = vperm.xlu0 %1809, %v2147_v13  }
 0x224   : > { %1807 = vset.pattern.permute.xlu1 %v1955_v1 }
 0x225   : > { %1151 = vperm.xlu1 %1807, %v2147_v13  }
 0x226   : > { %1175 = vperm.xlu0 %1809, %v2159_v16  }
 0x229   : > { %1808 = vset.pattern.permute.xlu1 %v1956_v2 }
 0x22a   : > { %1167 = vperm.xlu1 %1808, %v2152_v14   ;;  %1812 = vset.pattern.permute.xlu0 %v1960_v33 }
 0x22b   : > { %1192 = vperm.xlu0 %1812, %v2152_v14  }
 0x22e   : > { %1810 = vset.pattern.permute.xlu1 %v1955_v1 }
 0x22f   : > { %1155 = vperm.xlu1 %1810, %v2159_v16  }
 0x233   : > { %1159 = vperm.xlu1 %1810, %v2164_v17  }
 0x237   : > { %1811 = vset.pattern.permute.xlu1 %v1956_v2 }
 0x238   : > { %1179 = vperm.xlu1 %1811, %v2164_v17   ;;  %v789_v17 = vld [vmem:[#allocation6 + $0x8] sm:$0xff] }
 0x282   : > { %v1791_v3 = vpop.permute.xlu0 %1790  ;;  %v1786_v4 = vpop.permute.xlu1 %1785 }
 0x283   : > { %v1793_v5 = vunpack.i.h.bf16 %v1791_v3  ;;  %v1792_v6 = vunpack.i.l.bf16 %v1791_v3  ;;  %v1788_v7 = vunpack.i.h.bf16 %v1786_v4  ;;  %v1787_v8 = vunpack.i.l.bf16 %v1786_v4 }
 0x285   : > { %v1628_v13 = vpack.c.bf16 %v1788_v7, %v1787_v8  ;;  %v1634_v9 = vpack.c.bf16 %v1793_v5, %v1792_v6 }
 0x286   : > { %v1796_v16 = vpop.permute.xlu1 %1795  ;;  %v1801_v15 = vpop.permute.xlu0 %1800 }
 0x287   : > { %1630 = vmatprep.subr.msk.bf16.mxu1 %vm2176_vm2, %v1628_v13  ;;  %v1798_v11 = vunpack.i.h.bf16 %v1796_v16  ;;  %v1797_v12 = vunpack.i.l.bf16 %v1796_v16  ;;  %v1803_v20 = vunpack.i.h.bf16 %v1801_v15  ;;  %v1802_v21 = vunpack.i.l.bf16 %v1801_v15 }
 0x288   : > { %1633 = vmatpush3.bf16.msk.msra.mxu1 %vm2176_vm2, %v1628_v13 }
 0x289   : > { %1636 = vmatprep.subr.msk.bf16.mxu1 %vm2176_vm2, %v1634_v9  ;;  %v1648_v22 = vpack.c.bf16 %v1798_v11, %v1797_v12  ;;  %v1654_v24 = vpack.c.bf16 %v1803_v20, %v1802_v21 }
 0x28c   : > { %1639 = vmatpush3.bf16.msk.msra.mxu1 %vm2176_vm2, %v1634_v9 }
 0x28d   : > { %1641 = vmatprep.subr.bf16.mxu1 %v1640_v62 }
 0x28f   : > { %1552 = vmatmul.mubr.msk.f32.vlgmr.msra.gmra.mrb[0].mxu1 %vm355_vm0, %v789_v17 }
 0x290   : > { %1643 = vmatpush3.bf16.msra.mxu1 %v1640_v62  ;;  %1554 = vmatprep.mubr.msk.f32.mxu1 %vm355_vm0, %v790_v10 }
 0x291   : > { %1645 = vmatprep.subr.bf16.mxu1 %v1644_v63 }
 0x293   : > { %1555 = vmatmul.mubr.msk.f32.gmra.mrb[2].mxu1 %vm355_vm0, %v791_v18 }
 0x294   : > { %1647 = vmatpush3.bf16.msra.mxu1 %v1644_v63  ;;  %1565 = vmatprep.mubr.msk.f32.mxu1 %vm355_vm0, %v784_v19 }
 0x295   : > { %1650 = vmatprep.subr.msk.bf16.mxu1 %vm2193_vm4, %v1648_v22 }
 0x297   : > { %1566 = vmatmul.mubr.msk.f32.vlgmr.msra.gmra.mrb[0].mxu1 %vm355_vm0, %v785_v25  ;;  %v1094_v42 = vpop.permute.xlu1 %1093  ;;  %v1098_v34 = vpop.permute.xlu0 %1097 }
 0x298   : > { %1653 = vmatpush3.bf16.msk.msra.mxu1 %vm2193_vm4, %v1648_v22  ;;  %1568 = vmatprep.mubr.msk.f32.mxu1 %vm355_vm0, %v786_v23 }
 0x299   : > { %1656 = vmatprep.subr.msk.bf16.mxu1 %vm2193_vm4, %v1654_v24 }
 0x29b   : > { %1569 = vmatmul.mubr.msk.f32.gmra.mrb[2].mxu1 %vm355_vm0, %v787_v26  ;;  %v1102_v36 = vpop.permute.xlu1 %1101 }
 0x29c   : > { %1659 = vmatpush3.bf16.msk.msra.mxu1 %vm2193_vm4, %v1654_v24  ;;  %1579 = vmatprep.mubr.msk.f32.mxu1 %vm355_vm0, %v987_v27  ;;  %v1148_v10 = vpop.permute.xlu0 %1147 }
 0x29f   : > { %1580 = vmatmul.mubr.msk.f32.vlgmr.msra.gmra.mrb[0].mxu1 %vm355_vm0, %v988_v28  ;;  %v1106_v45 = vpop.permute.xlu1 %1105 }
 0x2a0   : > { %1582 = vmatprep.mubr.msk.f32.mxu1 %vm355_vm0, %v989_v29 }
 0x2a1   : > { %v1172_v12 = vpop.permute.xlu0 %1171 }
 0x2a3   : > { %1583 = vmatmul.mubr.msk.f32.gmra.mrb[2].mxu1 %vm355_vm0, %v990_v30 }
 0x2a4   : > { %v1152_v4 = vpop.permute.xlu1 %1151 }
 0x2a5   : > { %v1176_v22 = vpop.permute.xlu0 %1175 }
 0x2a9   : > { %v1168_v13 = vpop.permute.xlu1 %1167 }
 0x2ae   : > { %v1156_v17 = vpop.permute.xlu1 %1155 }
 0x2b2   : > { %v1160_v11 = vpop.permute.xlu1 %1159 }
 0x2b7   : > { %v1180_v25 = vpop.permute.xlu1 %1179 }
 0x372   : > { %v1581_v35 = vpop.f32.mrb[0].mxu1 }
 0x373   : > { %v1109_v37 = vadd.f32 %v1581_v35, %v1098_v34  ;;  %v1069_v38 = vpop.f32.mrb[1].mxu1 }
 0x374   : > { %v1108_v39 = vadd.f32 %v1094_v42, %v1069_v38  ;;  %v1190_v38 = vld [vmem:[%s2319_s4] sm:$0x1] }
 0x376   : > { %v1112_v40 = vadd.f32 %v1109_v37, %v1108_v39  ;;  %v1584_v41 = vpop.f32.mrb[2].mxu1 }
 0x377   : > { %v1079_v43 = vpop.f32.mrb[3].mxu1  ;;  %v1111_v46 = vadd.f32 %v1584_v41, %v1106_v45 }
 0x378   : > { %v1110_v44 = vadd.f32 %v1102_v36, %v1079_v43 }
 0x37a   : > { %v1113_v47 = vadd.f32 %v1112_v40, %v1110_v44 }
 0x37c   : > { %v1114_v48 = vadd.f32 %v1113_v47, %v1111_v46 }
 0x37e   : > { %v1115_v49 = vrot.slane %v1114_v48, 4 }
 0x380   : > { %v1116_v50 = vadd.f32 %v1115_v49, %v1114_v48 }
 0x382   : > { %v1117_v51 = vrot.slane %v1116_v50, 2 }
 0x384   : > { %v1118_v52 = vadd.f32 %v1117_v51, %v1116_v50 }
 0x386   : > { %v1119_v14 = vrot.slane %v1118_v52, 1 }
 0x388   : > { %v1120_v53 = vadd.f32 %v1119_v14, %v1118_v52 }
 0x38a   : > { %v1121_v54 = vmul.f32 0.03125, %v1120_v53 }
 0x38c   : > { %v1124_v55 = vsub.f32 %v1110_v44, %v1121_v54  ;;  %v1125_v56 = vsub.f32 %v1111_v46, %v1121_v54  ;;  %v1122_v57 = vsub.f32 %v1108_v39, %v1121_v54  ;;  %v1123_v58 = vsub.f32 %v1109_v37, %v1121_v54  ;;  %v1193_v39 = vpop.permute.xlu0 %1192 }
 0x38e   : > { %v1126_v59 = vmul.f32 %v1122_v57, %v1122_v57  ;;  %v1127_v60 = vmul.f32 %v1123_v58, %v1123_v58  ;;  %v1128_v61 = vmul.f32 %v1124_v55, %v1124_v55  ;;  %v1129_v63 = vmul.f32 %v1125_v56, %v1125_v56 }
 0x390   : > { %v1130_v62 = vadd.f32 %v1127_v60, %v1126_v59 }
 0x392   : > { %v1131_v0 = vadd.f32 %v1130_v62, %v1128_v61 }
 0x394   : > { %v1132_v1 = vadd.f32 %v1131_v0, %v1129_v63 }
 0x396   : > { %v1133_v2 = vrot.slane %v1132_v1, 4 }
 0x398   : > { %v1134_v3 = vadd.f32 %v1133_v2, %v1132_v1 }
 0x39a   : > { %v1135_v5 = vrot.slane %v1134_v3, 2 }
 0x39c   : > { %v1136_v6 = vadd.f32 %v1135_v5, %v1134_v3 }
 0x39e   : > { %v1137_v7 = vrot.slane %v1136_v6, 1 }
 0x3a0   : > { %v1138_v8 = vadd.f32 %v1137_v7, %v1136_v6 }
 0x3a2   : > { %v1139_v9 = vmul.f32 0.03125, %v1138_v8 }
 0x3a4   : > { %v1140_v16 = vadd.f32 1e-05, %v1139_v9 }
 0x3a6   : > { %1815 = vrsqrt.f32 %v1140_v16 }
 0x3b0   : > { %v1816_v15 = vpop.eup %1815 }
 0x3b1   : > { %v1143_v18 = vmul.f32 %v1816_v15, %v1123_v58  ;;  %v1144_v19 = vmul.f32 %v1816_v15, %v1124_v55  ;;  %v1142_v20 = vmul.f32 %v1816_v15, %v1122_v57  ;;  %v1145_v21 = vmul.f32 %v1816_v15, %v1125_v56 }
 0x3b3   : > { %v1163_v23 = vmul.f32 %v1152_v4, %v1143_v18  ;;  %v1164_v24 = vmul.f32 %v1156_v17, %v1144_v19  ;;  %v1162_v26 = vmul.f32 %v1148_v10, %v1142_v20  ;;  %v1165_v27 = vmul.f32 %v1160_v11, %v1145_v21 }
 0x3b5   : > { %v1182_v28 = vadd.f32 %v1168_v13, %v1162_v26  ;;  %v1183_v29 = vadd.f32 %v1172_v12, %v1163_v23  ;;  %v1184_v30 = vadd.f32 %v1176_v22, %v1164_v24  ;;  %v1185_v32 = vadd.f32 %v1180_v25, %v1165_v27 }
 0x3b7   : > { %v1186_v33 = vmax.f32 %v1182_v28, 0.0  ;;  %v1187_v42 = vmax.f32 %v1183_v29, 0.0  ;;  %v1188_v34 = vmax.f32 %v1184_v30, 0.0  ;;  %v1189_v35 = vmax.f32 %v1185_v32, 0.0 }
 0x3b9   : > { %v1661_v36 = vpack.c.bf16 %v1187_v42, %v1186_v33  ;;  %v1664_v37 = vpack.c.bf16 %v1189_v35, %v1188_v34 }
 0x3bb   : > { %1662 = vmatpush3.bf16.msra.mxu0 %v1661_v36 }
 0x3bc   : > { %1663 = vmatprep.subr.bf16.mxu0 %v1957_v31 }
 0x3bf   : > { %1665 = vmatpush3.bf16.msra.mxu0 %v1664_v37 }
 0x3c2   : > { %1594 = vmatmul.mubr.msk.f32.vlgmr.msra.gmra.mrb[4].mxu0 %vm355_vm0, %v1190_v38 }
 0x495   : > { %v1264_v40 = vpop.f32.mrb[4].mxu0 }
 0x496   : > { %v1265_v41 = vadd.f32 %v1264_v40, %v1193_v39  ;;  %v1595_v43 = vpop.f32.mrb[5].mxu0 }
 0x498   : > { %v1268_v44 = vmax.f32 %v1265_v41, 0.0 }
 0x49a   : > { %1269 = vst [vmem:[%s304_s26] sm:$0x1] %v1268_v44 }
 0x49b   : > { %1886 = shalt.err (!%p1883_p2)
}
 0x49c   : > { %s1887_s28 = scalar_lea.hbm %s2271_s25, 16  ;;  %s1891_s16 = scalar_lea.hbm %s2320_s5, 32 }
 0x49d   : > { %p1888_p0 = scmp.ne.s32.totalorder %s2271_s25, %s1887_s28  ;;  %p1892_p10 = scmp.lt.u32.totalorder %s2271_s25, %s2320_s5 }
 0x49e   : > { %p1893_p11 = scmp.lt.u32.totalorder %s1891_s16, %s1887_s28  ;;  %p1895_p4 = scmp.lt.u32.totalorder %s1887_s28, %s2271_s25 }
 0x49f   : > { %p1889_p5 = pnand %p1888_p0, %p2339_p3 }
 0x4a0   : > { %p1894_p12 = por %p1893_p11, %p1892_p10 }
 0x4a1   : > { %p1890_p6 = pneg %p1889_p5 }
 0x4a2   : > { %p1896_p7 = por %p1895_p4, %p1894_p12 }
 0x4a4   : > { %p1897_p8 = pnand %p1896_p7, %p1890_p6 }
 0x4a6   : > { %1900 = shalt.err (!%p1897_p8)
}
 0x4a7   : > { %1690 = dma.vmem_to_hbm [thread:$0]  (%p2339_p3), %s2273_s7, 16, %s2271_s25, %s1271_s8  }
 0x4a8 PF: > { %s1295_s11 = sand.u32 1, %s1931_s18   ;;  %p2340_p9 = scmp.ne.s32.totalorder %s2326_s30, 0 }
 0x4a9   : > { %s1296_s26 = scalar_lea.sflag [#allocation5], %s1295_s11 }
 0x4aa   : > { %p1700_p13 = pnand %p1370_p1, %p2340_p9 }
 0x4ac   : > { %1926 = dma.done.wait (!%p1700_p13), %s1296_s26, 16  }
 0x4ad   : > { %1928 = vsyncadd (!%p1700_p13), %s1296_s26, 4294967280  ;;  %p17_p2 = scmp.ge.s32.totalorder %s2017_s24, 4   ;;  %s2341_s18 = smov %s1935_s19 }
 0x4ae   : > { %s2342_s19 = smov %s1939_s20  ;;  %s2343_s20 = smov %s2029_s27 }
 0x4af   : > { %s2344_s21 = smov %s2017_s24  ;;  %19 = sbr.rel (!%p17_p2) target bundleno = 5 (0x5), region = 134 }
 0x4b6   :  { %1300 = vsyncpa [#allocation4], 1 }
 0x4b7   :  { %1302 = vsyncpa [#allocation4 + $0x1], 1 }
 0x4b8   :  { %1303 = vsyncpa [#allocation7], 1 }
 0x4b9   :  { %1304 = vsyncpa [#allocation5], 1 }
 0x4ba   :  { %1306 = vsyncpa [#allocation5 + $0x1], 1 }

</bundles_post_ra>
